<compile_context>
chip_gen: v7x
topology: tpu7x:2x2x1
jax: 0.10.0
libtpu: 0.0.40
codegen_flags: <defaults>
</compile_context>

<pallas_src>
import jax
import jax.numpy as jnp
from jax import lax
from jax.experimental import pallas as pl
from jax.experimental.pallas import tpu as pltpu

H1 = 256
H2 = 128
LN_EPS = 1e-5

_MAX_TB = 8192     # absolute per-step row cap (VMEM budget may lower it)
_ROW_ALIGN = 16    # bf16 sublane packing -> batch tiles in multiples of 16

# Flipped to False (once) if this jax build rejects pipeline_mode=pl.Buffered(1).
_CONST_SINGLE_BUFFER = [True]


def _round_up(n, m):
    return ((n + m - 1) // m) * m


# --------------------------------------------------------------------------
# Shared math (used by the kernel and by the numerics-emulating reference).
# --------------------------------------------------------------------------
def _centered_layernorm(h_c, gamma, beta):
    """LayerNorm over the last dim for an input that is already mean-free.

    The wrapper pre-centers the Linear weights/bias over the output axis, so
    h_c = (x @ W + b) - mean_over_features(x @ W + b) exactly (up to bf16
    rounding).  Only one cross-lane reduction (sum of squares) is needed per
    LayerNorm, and the biased variance is non-negative by construction.
    """
    inv_n = 1.0 / h_c.shape[-1]
    var = jnp.sum(h_c * h_c, axis=-1, keepdims=True) * inv_n
    return h_c * lax.rsqrt(var + LN_EPS) * gamma + beta


# --------------------------------------------------------------------------
# Kernel
# --------------------------------------------------------------------------
def corpus_routing_kernel(x_ref, w1_ref, p1_ref, w2_ref, p2_ref, p3_ref, o_ref):
    cdt = w2_ref.dtype          # MXU operand dtype (bf16 by default)

    x = x_ref[...]              # (tb, D), already in MXU operand dtype
    p1 = p1_ref[...]            # (3, H1): rows = [b1 - mean(b1), gamma1, beta1]
    p2 = p2_ref[...]            # (3, H2): rows = [b2 - mean(b2), gamma2, beta2]
    p3 = p3_ref[...]            # (2, H2): rows = [w3^T, b3 (replicated)]

    # fc1 -> ln1 -> relu   (dropout1: identity in eval mode)
    h = jnp.dot(x, w1_ref[...], preferred_element_type=jnp.float32)
    h = h + p1[0:1, :]                              # mean-free pre-activation
    h = _centered_layernorm(h, p1[1:2, :], p1[2:3, :])
    h = jnp.maximum(h, 0.0)

    # fc2 -> ln2 -> relu   (dropout2: identity in eval mode)
    h = jnp.dot(h.astype(cdt), w2_ref[...], preferred_element_type=jnp.float32)
    h = h + p2[0:1, :]
    h = _centered_layernorm(h, p2[1:2, :], p2[2:3, :])
    h = jnp.maximum(h, 0.0)

    # fc3: single output column -> VPU multiply + lane reduce (no N=1 MXU matmul)
    w3_row = p3[0:1, :]                             # (1, H2)
    b3 = p3[1:2, 0:1]                               # (1, 1)
    out = jnp.sum(h * w3_row, axis=-1, keepdims=True) + b3
    o_ref[...] = out.astype(o_ref.dtype)


# --------------------------------------------------------------------------
# Wrapper-side planning (generation-aware VMEM budgeting / tiling)
# --------------------------------------------------------------------------
def _physical_vmem_bytes():
    # v4 / v5e / v6e have 128 MiB of VMEM per core; v7x has 64 MiB per
    # TensorCore.  Unknown chips fall back to the conservative 64 MiB.
    try:
        kind = jax.devices()[0].device_kind.lower()
    except Exception:
        return 64 << 20
    for tag in ("v4", "v5", "v6"):
        if tag in kind:
            return 128 << 20
    return 64 << 20


def _per_row_vmem(d_lane, x_itemsize):
    # Per batch-tile row:
    #   x tile (double-buffered)                       : 2 * d_lane * x_itemsize
    #   (tb, 1) f32 out tile, lane-padded, 2 buffers   : 2 * 128 * 4
    #   intermediates h1(f32) + h1(bf16) + h2(f32) + LN temps ~= 2.5 KiB
    return 2 * d_lane * x_itemsize + 2 * 128 * 4 + 2560


def _fixed_vmem(D):
    # Weight / packed-param operands; conservatively assume double-buffered
    # even though they are requested single-buffered via pl.Buffered(1).
    return 2 * ((D * H1 + H1 * H2) * 2 + 8 * (H1 + 2 * H2) * 4)


def _plan_tiles(B, D, x_itemsize):
    phys = _physical_vmem_bytes()
    d_lane = _round_up(max(D, 128), 128)
    per_row = _per_row_vmem(d_lane, x_itemsize)
    budget = phys // 2 - _fixed_vmem(D)     # keep half of VMEM as slack
    cap = max(_ROW_ALIGN,
              min(_MAX_TB, (budget // per_row) // _ROW_ALIGN * _ROW_ALIGN))

    if B < 256:
        # Tiny batch: a single tile (second TC would only see padding anyway).
        tb = min(cap, _round_up(B, _ROW_ALIGN))
        num_tiles = pl.cdiv(_round_up(B, _ROW_ALIGN), tb)
        if num_tiles > 1 and num_tiles % 2:
            num_tiles += 1
    else:
        # >=2 tiles, even count: balanced across v7x's two TensorCores.
        num_tiles = max(2, pl.cdiv(B, cap))
        if num_tiles % 2:
            num_tiles += 1
        tb = _round_up(pl.cdiv(B, num_tiles), _ROW_ALIGN)
    return tb, num_tiles


def _vmem_limit_bytes(tb, D, x_itemsize):
    phys = _physical_vmem_bytes()
    d_lane = _round_up(max(D, 128), 128)
    need = _per_row_vmem(d_lane, x_itemsize) * tb + _fixed_vmem(D)
    # 1.5x headroom for compiler-internal scratch, clamped under the physical
    # capacity of the current generation.
    return min(phys - (4 << 20), max(32 << 20, int(need * 1.5) + (2 << 20)))


def _in_specs(tb, D, single_buffer_consts):
    def const(shape):
        if single_buffer_consts:
            # Constant index_map: the block never changes across the grid, so a
            # single buffer halves the resident VMEM of the weight operands.
            return pl.BlockSpec(shape, lambda i: (0, 0),
                                pipeline_mode=pl.Buffered(1))
        return pl.BlockSpec(shape, lambda i: (0, 0))

    return [
        pl.BlockSpec((tb, D), lambda i: (i, 0)),   # x batch tile (bf16)
        const((D, H1)),    # centered w1 (bf16)
        const((3, H1)),    # [b1 - mean(b1); gamma1; beta1]
        const((H1, H2)),   # centered w2 (bf16)
        const((3, H2)),    # [b2 - mean(b2); gamma2; beta2]
        const((2, H2)),    # [w3^T; b3]
    ]


# --------------------------------------------------------------------------
# Parameter packing (wrapper-side layout plumbing)
# --------------------------------------------------------------------------
def _pack_params(params, matmul_dtype):
    """Pre-center Linear weights/bias over the output axis (removes both
    LayerNorm mean reductions from the kernel) and pack small vectors."""
    w1, b1, g1, be1, w2, b2, g2, be2, w3, b3 = params
    w1c = (w1 - jnp.mean(w1, axis=1, keepdims=True)).astype(matmul_dtype)   # (D, H1)
    w2c = (w2 - jnp.mean(w2, axis=1, keepdims=True)).astype(matmul_dtype)   # (H1, H2)
    b1c = (b1 - jnp.mean(b1)).astype(jnp.float32)
    b2c = (b2 - jnp.mean(b2)).astype(jnp.float32)
    p1 = jnp.concatenate([b1c, g1, be1], axis=0).astype(jnp.float32)        # (3, H1)
    p2 = jnp.concatenate([b2c, g2, be2], axis=0).astype(jnp.float32)        # (3, H2)
    p3 = jnp.concatenate(
        [w3.reshape(1, H2),
         jnp.broadcast_to(b3.reshape(1, 1), (1, H2))], axis=0
    ).astype(jnp.float32)                                                   # (2, H2)
    return w1c, p1, w2c, p2, p3


# --------------------------------------------------------------------------
# Forward
# --------------------------------------------------------------------------
def corpus_routing_forward(x, params, *, tb=None, matmul_dtype=jnp.bfloat16):
    """x: (B, input_dim). Returns (B, 1) float32.

    Producers should pass x already cast to `matmul_dtype` (bf16) to avoid an
    extra f32 HBM round-trip for the only stream that scales with B*D; f32
    input is cast once in the wrapper.
    """
    B, D = x.shape
    w1c, p1, w2c, p2, p3 = _pack_params(params, matmul_dtype)
    assert w1c.shape[0] == D, (w1c.shape, D)

    if x.dtype != matmul_dtype:
        x = x.astype(matmul_dtype)
    x_itemsize = jnp.dtype(matmul_dtype).itemsize

    if tb is None:
        tb, num_tiles = _plan_tiles(B, D, x_itemsize)
    else:
        tb = max(_ROW_ALIGN, _round_up(tb, _ROW_ALIGN))
        num_tiles = pl.cdiv(B, tb)
        if num_tiles > 1 and num_tiles % 2:
            num_tiles += 1
    b_pad = num_tiles * tb
    if b_pad != B:
        x = jnp.pad(x, ((0, b_pad - B), (0, 0)))

    flops = 2 * b_pad * (D * H1 + H1 * H2 + H2) + 8 * b_pad * (H1 + H2)
    bytes_accessed = (
        b_pad * D * x_itemsize + b_pad * 4
        + w1c.size * w1c.dtype.itemsize + w2c.size * w2c.dtype.itemsize
        + (p1.size + p2.size + p3.size) * 4
    )
    cost = pl.CostEstimate(flops=int(flops),
                           transcendentals=int(2 * b_pad),
                           bytes_accessed=int(bytes_accessed))
    cparams = pltpu.CompilerParams(
        dimension_semantics=("parallel",),
        vmem_limit_bytes=int(_vmem_limit_bytes(tb, D, x_itemsize)),
    )

    def run(single_buffer_consts):
        return pl.pallas_call(
            corpus_routing_kernel,
            out_shape=jax.ShapeDtypeStruct((b_pad, 1), jnp.float32),
            grid_spec=pltpu.PrefetchScalarGridSpec(
                num_scalar_prefetch=0,
                grid=(num_tiles,),
                in_specs=_in_specs(tb, D, single_buffer_consts),
                out_specs=pl.BlockSpec((tb, 1), lambda i: (i, 0)),
            ),
            compiler_params=cparams,
            cost_estimate=cost,
        )(x, w1c, p1, w2c, p2, p3)

    if _CONST_SINGLE_BUFFER[0]:
        try:
            out = run(True)
        except Exception:
            # This jax build does not accept pl.Buffered(1) on the outer
            # pipeline; fall back to default double-buffered constants.
            _CONST_SINGLE_BUFFER[0] = False
            out = run(False)
    else:
        out = run(False)

    return out[:B]


# --------------------------------------------------------------------------
# Parameters & references
# --------------------------------------------------------------------------
def init_params(key, input_dim):
    """Deterministic synthetic parameters (shapes match CorpusRoutingNN.__init__)."""
    ks = jax.random.split(key, 6)

    def lin(kw, kb, fan_in, fan_out):
        bound = 1.0 / jnp.sqrt(jnp.float32(fan_in))
        w = jax.random.uniform(kw, (fan_in, fan_out), jnp.float32, -bound, bound)
        b = jax.random.uniform(kb, (1, fan_out), jnp.float32, -bound, bound)
        return w, b

    w1, b1 = lin(ks[0], ks[1], input_dim, H1)
    w2, b2 = lin(ks[2], ks[3], H1, H2)
    w3, b3 = lin(ks[4], ks[5], H2, 1)
    # nn.LayerNorm default affine init: weight=1, bias=0
    g1, be1 = jnp.ones((1, H1), jnp.float32), jnp.zeros((1, H1), jnp.float32)
    g2, be2 = jnp.ones((1, H2), jnp.float32), jnp.zeros((1, H2), jnp.float32)
    return (w1, b1, g1, be1, w2, b2, g2, be2, w3, b3)


def _layernorm_ref(h, gamma, beta):
    mu = jnp.mean(h, axis=-1, keepdims=True)
    var = jnp.mean(jnp.square(h - mu), axis=-1, keepdims=True)
    return (h - mu) * lax.rsqrt(var + LN_EPS) * gamma + beta


def reference_forward(x, params):
    """Pure-f32 reference of the PyTorch forward (eval mode, exact semantics)."""
    w1, b1, g1, be1, w2, b2, g2, be2, w3, b3 = params
    h = x @ w1 + b1
    h = jnp.maximum(_layernorm_ref(h, g1, be1), 0.0)
    h = h @ w2 + b2
    h = jnp.maximum(_layernorm_ref(h, g2, be2), 0.0)
    return h @ w3 + b3


def reference_forward_emulated(x, params, matmul_dtype=jnp.bfloat16):
    """Pure-JAX emulation of the kernel's exact numerics (pre-centered weights,
    bf16 MXU operands, f32 accumulation, single-reduction LayerNorm)."""
    w1c, p1, w2c, p2, p3 = _pack_params(params, matmul_dtype)
    h = jnp.dot(x.astype(matmul_dtype), w1c, preferred_element_type=jnp.float32)
    h = h + p1[0:1]
    h = jnp.maximum(_centered_layernorm(h, p1[1:2], p1[2:3]), 0.0)
    h = jnp.dot(h.astype(matmul_dtype), w2c, preferred_element_type=jnp.float32)
    h = h + p2[0:1]
    h = jnp.maximum(_centered_layernorm(h, p2[1:2], p2[2:3]), 0.0)
    return jnp.sum(h * p3[0:1], axis=-1, keepdims=True) + p3[1:2, 0:1]


# --------------------------------------------------------------------------
if __name__ == "__main__":
    key = jax.random.PRNGKey(0)
    k_param, k_x1, k_x2 = jax.random.split(key, 3)

    input_dim = 32
    params = init_params(k_param, input_dim)

    # Case 1: tiny batch (single tile).  Case 2: batch large enough to exercise
    # the multi-tile even-step path plus row padding.
    x_small = jax.random.normal(k_x1, (2, input_dim), jnp.float32)
    x_big = jax.random.normal(k_x2, (600, input_dim), jnp.float32)

    for x in (x_small, x_big):
        out = jax.block_until_ready(corpus_routing_forward(x, params))
        assert out.shape == (x.shape[0], 1), out.shape

        # Tight check against a reference reproducing the kernel's numerics,
        # loose check against the exact f32 PyTorch semantics (bf16 MXU
        # operands are an accepted, documented precision deviation).
        ref_emul = reference_forward_emulated(x, params)
        ref_f32 = reference_forward(x, params)
        err_emul = float(jnp.max(jnp.abs(out - ref_emul)))
        err_f32 = float(jnp.max(jnp.abs(out - ref_f32)))
        assert jnp.allclose(out, ref_emul, atol=5e-3, rtol=5e-3), err_emul
        assert jnp.allclose(out, ref_f32, atol=1e-1, rtol=1e-1), err_f32

    print("KERNEL_OK")
</pallas_src>

<mosaic_0001>
module attributes {stable_mosaic.version = 11 : i64} {
  func.func @corpus_routing_kernel(%arg0: i32, %arg1: memref<16x32xbf16, #tpu.memory_space<vmem>>, %arg2: memref<32x256xbf16, #tpu.memory_space<vmem>>, %arg3: memref<3x256xf32, #tpu.memory_space<vmem>>, %arg4: memref<256x128xbf16, #tpu.memory_space<vmem>>, %arg5: memref<3x128xf32, #tpu.memory_space<vmem>>, %arg6: memref<2x128xf32, #tpu.memory_space<vmem>>, %arg7: memref<16x1xf32, #tpu.memory_space<vmem>>) attributes {dimension_semantics = [#tpu.dimension_semantics<parallel>], iteration_bounds = array<i64: 1>, scalar_prefetch = 0 : i64, scratch_operands = 0 : i64, tpu.core_type = #tpu.core_type<tc>, window_params = [{transform_indices = @transform_0, window_bounds = array<i64: 16, 32>}, {pipeline_mode = #tpu.pipeline_mode<synchronous>, transform_indices = @transform_1, window_bounds = array<i64: 32, 256>}, {pipeline_mode = #tpu.pipeline_mode<synchronous>, transform_indices = @transform_2, window_bounds = array<i64: 3, 256>}, {pipeline_mode = #tpu.pipeline_mode<synchronous>, transform_indices = @transform_3, window_bounds = array<i64: 256, 128>}, {pipeline_mode = #tpu.pipeline_mode<synchronous>, transform_indices = @transform_4, window_bounds = array<i64: 3, 128>}, {pipeline_mode = #tpu.pipeline_mode<synchronous>, transform_indices = @transform_5, window_bounds = array<i64: 2, 128>}, {transform_indices = @transform_6, window_bounds = array<i64: 16, 1>}]} {
    %c0 = arith.constant 0 : index
    %c0_0 = arith.constant 0 : index
    %0 = vector.load %arg1[%c0, %c0_0] : memref<16x32xbf16, #tpu.memory_space<vmem>>, vector<16x32xbf16>
    %c0_1 = arith.constant 0 : index
    %c0_2 = arith.constant 0 : index
    %1 = vector.load %arg3[%c0_1, %c0_2] : memref<3x256xf32, #tpu.memory_space<vmem>>, vector<3x256xf32>
    %c0_3 = arith.constant 0 : index
    %c0_4 = arith.constant 0 : index
    %2 = vector.load %arg5[%c0_3, %c0_4] : memref<3x128xf32, #tpu.memory_space<vmem>>, vector<3x128xf32>
    %c0_5 = arith.constant 0 : index
    %c0_6 = arith.constant 0 : index
    %3 = vector.load %arg6[%c0_5, %c0_6] : memref<2x128xf32, #tpu.memory_space<vmem>>, vector<2x128xf32>
    %c0_7 = arith.constant 0 : index
    %c0_8 = arith.constant 0 : index
    %4 = vector.load %arg2[%c0_7, %c0_8] : memref<32x256xbf16, #tpu.memory_space<vmem>>, vector<32x256xbf16>
    %cst = arith.constant dense<0.000000e+00> : vector<16x256xf32>
    %5 = tpu.matmul %0, %4, %cst {dimension_numbers = #tpu.dot_dimension_numbers<[1], [0], [0], [1], [0, 0, 1, 1], [], []>} : vector<16x32xbf16>, vector<32x256xbf16>, vector<16x256xf32> -> vector<16x256xf32>
    %6 = vector.extract_strided_slice %1 {offsets = [0, 0], sizes = [1, 256], strides = [1, 1]} : vector<3x256xf32> to vector<1x256xf32>
    %7 = vector.broadcast %6 : vector<1x256xf32> to vector<16x256xf32>
    %8 = arith.addf %5, %7 : vector<16x256xf32>
    %9 = vector.extract_strided_slice %1 {offsets = [1, 0], sizes = [1, 256], strides = [1, 1]} : vector<3x256xf32> to vector<1x256xf32>
    %10 = vector.extract_strided_slice %1 {offsets = [2, 0], sizes = [1, 256], strides = [1, 1]} : vector<3x256xf32> to vector<1x256xf32>
    %11 = arith.mulf %8, %8 : vector<16x256xf32>
    %cst_9 = arith.constant dense<0.000000e+00> : vector<16xf32>
    %12 = vector.multi_reduction <add>, %11, %cst_9 [1] : vector<16x256xf32> to vector<16xf32>
    %13 = vector.shape_cast %12 : vector<16xf32> to vector<16x1xf32>
    %cst_10 = arith.constant 3.906250e-03 : f32
    %14 = vector.broadcast %cst_10 : f32 to vector<16x1xf32>
    %15 = arith.mulf %13, %14 : vector<16x1xf32>
    %cst_11 = arith.constant 9.99999974E-6 : f32
    %16 = vector.broadcast %cst_11 : f32 to vector<16x1xf32>
    %17 = arith.addf %15, %16 : vector<16x1xf32>
    %18 = math.rsqrt %17 : vector<16x1xf32>
    %19 = vector.broadcast %18 : vector<16x1xf32> to vector<16x256xf32>
    %20 = arith.mulf %8, %19 : vector<16x256xf32>
    %21 = vector.broadcast %9 : vector<1x256xf32> to vector<16x256xf32>
    %22 = arith.mulf %20, %21 : vector<16x256xf32>
    %23 = vector.broadcast %10 : vector<1x256xf32> to vector<16x256xf32>
    %24 = arith.addf %22, %23 : vector<16x256xf32>
    %cst_12 = arith.constant 0.000000e+00 : f32
    %25 = vector.broadcast %cst_12 : f32 to vector<16x256xf32>
    %26 = arith.maximumf %24, %25 : vector<16x256xf32>
    %27 = arith.truncf %26 : vector<16x256xf32> to vector<16x256xbf16>
    %c0_13 = arith.constant 0 : index
    %c0_14 = arith.constant 0 : index
    %28 = vector.load %arg4[%c0_13, %c0_14] : memref<256x128xbf16, #tpu.memory_space<vmem>>, vector<256x128xbf16>
    %cst_15 = arith.constant dense<0.000000e+00> : vector<16x128xf32>
    %29 = tpu.matmul %27, %28, %cst_15 {dimension_numbers = #tpu.dot_dimension_numbers<[1], [0], [0], [1], [0, 0, 1, 1], [], []>} : vector<16x256xbf16>, vector<256x128xbf16>, vector<16x128xf32> -> vector<16x128xf32>
    %30 = vector.extract_strided_slice %2 {offsets = [0, 0], sizes = [1, 128], strides = [1, 1]} : vector<3x128xf32> to vector<1x128xf32>
    %31 = vector.broadcast %30 : vector<1x128xf32> to vector<16x128xf32>
    %32 = arith.addf %29, %31 : vector<16x128xf32>
    %33 = vector.extract_strided_slice %2 {offsets = [1, 0], sizes = [1, 128], strides = [1, 1]} : vector<3x128xf32> to vector<1x128xf32>
    %34 = vector.extract_strided_slice %2 {offsets = [2, 0], sizes = [1, 128], strides = [1, 1]} : vector<3x128xf32> to vector<1x128xf32>
    %35 = arith.mulf %32, %32 : vector<16x128xf32>
    %cst_16 = arith.constant dense<0.000000e+00> : vector<16xf32>
    %36 = vector.multi_reduction <add>, %35, %cst_16 [1] : vector<16x128xf32> to vector<16xf32>
    %37 = vector.shape_cast %36 : vector<16xf32> to vector<16x1xf32>
    %cst_17 = arith.constant 7.812500e-03 : f32
    %38 = vector.broadcast %cst_17 : f32 to vector<16x1xf32>
    %39 = arith.mulf %37, %38 : vector<16x1xf32>
    %cst_18 = arith.constant 9.99999974E-6 : f32
    %40 = vector.broadcast %cst_18 : f32 to vector<16x1xf32>
    %41 = arith.addf %39, %40 : vector<16x1xf32>
    %42 = math.rsqrt %41 : vector<16x1xf32>
    %43 = vector.broadcast %42 : vector<16x1xf32> to vector<16x128xf32>
    %44 = arith.mulf %32, %43 : vector<16x128xf32>
    %45 = vector.broadcast %33 : vector<1x128xf32> to vector<16x128xf32>
    %46 = arith.mulf %44, %45 : vector<16x128xf32>
    %47 = vector.broadcast %34 : vector<1x128xf32> to vector<16x128xf32>
    %48 = arith.addf %46, %47 : vector<16x128xf32>
    %cst_19 = arith.constant 0.000000e+00 : f32
    %49 = vector.broadcast %cst_19 : f32 to vector<16x128xf32>
    %50 = arith.maximumf %48, %49 : vector<16x128xf32>
    %51 = vector.extract_strided_slice %3 {offsets = [0, 0], sizes = [1, 128], strides = [1, 1]} : vector<2x128xf32> to vector<1x128xf32>
    %52 = vector.extract_strided_slice %3 {offsets = [1, 0], sizes = [1, 1], strides = [1, 1]} : vector<2x128xf32> to vector<1x1xf32>
    %53 = vector.broadcast %51 : vector<1x128xf32> to vector<16x128xf32>
    %54 = arith.mulf %50, %53 : vector<16x128xf32>
    %cst_20 = arith.constant dense<0.000000e+00> : vector<16xf32>
    %55 = vector.multi_reduction <add>, %54, %cst_20 [1] : vector<16x128xf32> to vector<16xf32>
    %56 = vector.shape_cast %55 : vector<16xf32> to vector<16x1xf32>
    %57 = vector.broadcast %52 : vector<1x1xf32> to vector<16x1xf32>
    %58 = arith.addf %56, %57 : vector<16x1xf32>
    %c0_21 = arith.constant 0 : index
    %c0_22 = arith.constant 0 : index
    %59 = vector.load %arg7[%c0_21, %c0_22] : memref<16x1xf32, #tpu.memory_space<vmem>>, vector<16x1xf32>
    tpu.vector_store %arg7[%c0_21, %c0_22], %58 {strides = array<i32>} : memref<16x1xf32, #tpu.memory_space<vmem>>, vector<16x1xf32>,
    return
  }
  func.func @transform_0(%arg0: i32) -> (i32, i32) {
    %c0_i32 = arith.constant 0 : i32
    %c0_i32_0 = arith.constant 0 : i32
    return %arg0, %c0_i32 : i32, i32
  }
  func.func @transform_1(%arg0: i32) -> (i32, i32) {
    %c0_i32 = arith.constant 0 : i32
    %c0_i32_0 = arith.constant 0 : i32
    %c0_i32_1 = arith.constant 0 : i32
    return %c0_i32, %c0_i32_0 : i32, i32
  }
  func.func @transform_2(%arg0: i32) -> (i32, i32) {
    %c0_i32 = arith.constant 0 : i32
    %c0_i32_0 = arith.constant 0 : i32
    %c0_i32_1 = arith.constant 0 : i32
    return %c0_i32, %c0_i32_0 : i32, i32
  }
  func.func @transform_3(%arg0: i32) -> (i32, i32) {
    %c0_i32 = arith.constant 0 : i32
    %c0_i32_0 = arith.constant 0 : i32
    %c0_i32_1 = arith.constant 0 : i32
    return %c0_i32, %c0_i32_0 : i32, i32
  }
  func.func @transform_4(%arg0: i32) -> (i32, i32) {
    %c0_i32 = arith.constant 0 : i32
    %c0_i32_0 = arith.constant 0 : i32
    %c0_i32_1 = arith.constant 0 : i32
    return %c0_i32, %c0_i32_0 : i32, i32
  }
  func.func @transform_5(%arg0: i32) -> (i32, i32) {
    %c0_i32 = arith.constant 0 : i32
    %c0_i32_0 = arith.constant 0 : i32
    %c0_i32_1 = arith.constant 0 : i32
    return %c0_i32, %c0_i32_0 : i32, i32
  }
  func.func @transform_6(%arg0: i32) -> (i32, i32) {
    %c0_i32 = arith.constant 0 : i32
    %c0_i32_0 = arith.constant 0 : i32
    return %arg0, %c0_i32 : i32, i32
  }
}

module attributes {stable_mosaic.version = 11 : i64} {
  func.func @corpus_routing_kernel(%arg0: i32, %arg1: memref<16x32xbf16, #tpu.memory_space<vmem>>, %arg2: memref<32x256xbf16, #tpu.memory_space<vmem>>, %arg3: memref<3x256xf32, #tpu.memory_space<vmem>>, %arg4: memref<256x128xbf16, #tpu.memory_space<vmem>>, %arg5: memref<3x128xf32, #tpu.memory_space<vmem>>, %arg6: memref<2x128xf32, #tpu.memory_space<vmem>>, %arg7: memref<16x1xf32, #tpu.memory_space<vmem>>) attributes {dimension_semantics = [#tpu.dimension_semantics<parallel>], iteration_bounds = array<i64: 1>, scalar_prefetch = 0 : i64, scratch_operands = 0 : i64, tpu.core_type = #tpu.core_type<tc>, window_params = [{transform_indices = @transform_0, window_bounds = array<i64: 16, 32>}, {pipeline_mode = #tpu.pipeline_mode<synchronous>, transform_indices = @transform_1, window_bounds = array<i64: 32, 256>}, {pipeline_mode = #tpu.pipeline_mode<synchronous>, transform_indices = @transform_2, window_bounds = array<i64: 3, 256>}, {pipeline_mode = #tpu.pipeline_mode<synchronous>, transform_indices = @transform_3, window_bounds = array<i64: 256, 128>}, {pipeline_mode = #tpu.pipeline_mode<synchronous>, transform_indices = @transform_4, window_bounds = array<i64: 3, 128>}, {pipeline_mode = #tpu.pipeline_mode<synchronous>, transform_indices = @transform_5, window_bounds = array<i64: 2, 128>}, {transform_indices = @transform_6, window_bounds = array<i64: 16, 1>}]} {
    %c0 = arith.constant 0 : index
    %c0_0 = arith.constant 0 : index
    %0 = vector.load %arg1[%c0, %c0_0] : memref<16x32xbf16, #tpu.memory_space<vmem>>, vector<16x32xbf16>
    %c0_1 = arith.constant 0 : index
    %c0_2 = arith.constant 0 : index
    %1 = vector.load %arg3[%c0_1, %c0_2] : memref<3x256xf32, #tpu.memory_space<vmem>>, vector<3x256xf32>
    %c0_3 = arith.constant 0 : index
    %c0_4 = arith.constant 0 : index
    %2 = vector.load %arg5[%c0_3, %c0_4] : memref<3x128xf32, #tpu.memory_space<vmem>>, vector<3x128xf32>
    %c0_5 = arith.constant 0 : index
    %c0_6 = arith.constant 0 : index
    %3 = vector.load %arg6[%c0_5, %c0_6] : memref<2x128xf32, #tpu.memory_space<vmem>>, vector<2x128xf32>
    %c0_7 = arith.constant 0 : index
    %c0_8 = arith.constant 0 : index
    %4 = vector.load %arg2[%c0_7, %c0_8] : memref<32x256xbf16, #tpu.memory_space<vmem>>, vector<32x256xbf16>
    %cst = arith.constant dense<0.000000e+00> : vector<16x256xf32>
    %5 = tpu.matmul %0, %4, %cst {dimension_numbers = #tpu.dot_dimension_numbers<[1], [0], [0], [1], [0, 0, 1, 1], [], []>} : vector<16x32xbf16>, vector<32x256xbf16>, vector<16x256xf32> -> vector<16x256xf32>
    %6 = vector.extract_strided_slice %1 {offsets = [0, 0], sizes = [1, 256], strides = [1, 1]} : vector<3x256xf32> to vector<1x256xf32>
    %7 = vector.broadcast %6 : vector<1x256xf32> to vector<16x256xf32>
    %8 = arith.addf %5, %7 : vector<16x256xf32>
    %9 = vector.extract_strided_slice %1 {offsets = [1, 0], sizes = [1, 256], strides = [1, 1]} : vector<3x256xf32> to vector<1x256xf32>
    %10 = vector.extract_strided_slice %1 {offsets = [2, 0], sizes = [1, 256], strides = [1, 1]} : vector<3x256xf32> to vector<1x256xf32>
    %11 = arith.mulf %8, %8 : vector<16x256xf32>
    %cst_9 = arith.constant dense<0.000000e+00> : vector<16xf32>
    %12 = vector.multi_reduction <add>, %11, %cst_9 [1] : vector<16x256xf32> to vector<16xf32>
    %13 = vector.shape_cast %12 : vector<16xf32> to vector<16x1xf32>
    %cst_10 = arith.constant 3.906250e-03 : f32
    %14 = vector.broadcast %cst_10 : f32 to vector<16x1xf32>
    %15 = arith.mulf %13, %14 : vector<16x1xf32>
    %cst_11 = arith.constant 9.99999974E-6 : f32
    %16 = vector.broadcast %cst_11 : f32 to vector<16x1xf32>
    %17 = arith.addf %15, %16 : vector<16x1xf32>
    %18 = math.rsqrt %17 : vector<16x1xf32>
    %19 = vector.broadcast %18 : vector<16x1xf32> to vector<16x256xf32>
    %20 = arith.mulf %8, %19 : vector<16x256xf32>
    %21 = vector.broadcast %9 : vector<1x256xf32> to vector<16x256xf32>
    %22 = arith.mulf %20, %21 : vector<16x256xf32>
    %23 = vector.broadcast %10 : vector<1x256xf32> to vector<16x256xf32>
    %24 = arith.addf %22, %23 : vector<16x256xf32>
    %cst_12 = arith.constant 0.000000e+00 : f32
    %25 = vector.broadcast %cst_12 : f32 to vector<16x256xf32>
    %26 = arith.maximumf %24, %25 : vector<16x256xf32>
    %27 = arith.truncf %26 : vector<16x256xf32> to vector<16x256xbf16>
    %c0_13 = arith.constant 0 : index
    %c0_14 = arith.constant 0 : index
    %28 = vector.load %arg4[%c0_13, %c0_14] : memref<256x128xbf16, #tpu.memory_space<vmem>>, vector<256x128xbf16>
    %cst_15 = arith.constant dense<0.000000e+00> : vector<16x128xf32>
    %29 = tpu.matmul %27, %28, %cst_15 {dimension_numbers = #tpu.dot_dimension_numbers<[1], [0], [0], [1], [0, 0, 1, 1], [], []>} : vector<16x256xbf16>, vector<256x128xbf16>, vector<16x128xf32> -> vector<16x128xf32>
    %30 = vector.extract_strided_slice %2 {offsets = [0, 0], sizes = [1, 128], strides = [1, 1]} : vector<3x128xf32> to vector<1x128xf32>
    %31 = vector.broadcast %30 : vector<1x128xf32> to vector<16x128xf32>
    %32 = arith.addf %29, %31 : vector<16x128xf32>
    %33 = vector.extract_strided_slice %2 {offsets = [1, 0], sizes = [1, 128], strides = [1, 1]} : vector<3x128xf32> to vector<1x128xf32>
    %34 = vector.extract_strided_slice %2 {offsets = [2, 0], sizes = [1, 128], strides = [1, 1]} : vector<3x128xf32> to vector<1x128xf32>
    %35 = arith.mulf %32, %32 : vector<16x128xf32>
    %cst_16 = arith.constant dense<0.000000e+00> : vector<16xf32>
    %36 = vector.multi_reduction <add>, %35, %cst_16 [1] : vector<16x128xf32> to vector<16xf32>
    %37 = vector.shape_cast %36 : vector<16xf32> to vector<16x1xf32>
    %cst_17 = arith.constant 7.812500e-03 : f32
    %38 = vector.broadcast %cst_17 : f32 to vector<16x1xf32>
    %39 = arith.mulf %37, %38 : vector<16x1xf32>
    %cst_18 = arith.constant 9.99999974E-6 : f32
    %40 = vector.broadcast %cst_18 : f32 to vector<16x1xf32>
    %41 = arith.addf %39, %40 : vector<16x1xf32>
    %42 = math.rsqrt %41 : vector<16x1xf32>
    %43 = vector.broadcast %42 : vector<16x1xf32> to vector<16x128xf32>
    %44 = arith.mulf %32, %43 : vector<16x128xf32>
    %45 = vector.broadcast %33 : vector<1x128xf32> to vector<16x128xf32>
    %46 = arith.mulf %44, %45 : vector<16x128xf32>
    %47 = vector.broadcast %34 : vector<1x128xf32> to vector<16x128xf32>
    %48 = arith.addf %46, %47 : vector<16x128xf32>
    %cst_19 = arith.constant 0.000000e+00 : f32
    %49 = vector.broadcast %cst_19 : f32 to vector<16x128xf32>
    %50 = arith.maximumf %48, %49 : vector<16x128xf32>
    %51 = vector.extract_strided_slice %3 {offsets = [0, 0], sizes = [1, 128], strides = [1, 1]} : vector<2x128xf32> to vector<1x128xf32>
    %52 = vector.extract_strided_slice %3 {offsets = [1, 0], sizes = [1, 1], strides = [1, 1]} : vector<2x128xf32> to vector<1x1xf32>
    %53 = vector.broadcast %51 : vector<1x128xf32> to vector<16x128xf32>
    %54 = arith.mulf %50, %53 : vector<16x128xf32>
    %cst_20 = arith.constant dense<0.000000e+00> : vector<16xf32>
    %55 = vector.multi_reduction <add>, %54, %cst_20 [1] : vector<16x128xf32> to vector<16xf32>
    %56 = vector.shape_cast %55 : vector<16xf32> to vector<16x1xf32>
    %57 = vector.broadcast %52 : vector<1x1xf32> to vector<16x1xf32>
    %58 = arith.addf %56, %57 : vector<16x1xf32>
    %c0_21 = arith.constant 0 : index
    %c0_22 = arith.constant 0 : index
    %59 = vector.load %arg7[%c0_21, %c0_22] : memref<16x1xf32, #tpu.memory_space<vmem>>, vector<16x1xf32>
    tpu.vector_store %arg7[%c0_21, %c0_22], %58 {strides = array<i32>} : memref<16x1xf32, #tpu.memory_space<vmem>>, vector<16x1xf32>,
    return
  }
  func.func @transform_0(%arg0: i32) -> (i32, i32) {
    %c0_i32 = arith.constant 0 : i32
    %c0_i32_0 = arith.constant 0 : i32
    return %arg0, %c0_i32 : i32, i32
  }
  func.func @transform_1(%arg0: i32) -> (i32, i32) {
    %c0_i32 = arith.constant 0 : i32
    %c0_i32_0 = arith.constant 0 : i32
    %c0_i32_1 = arith.constant 0 : i32
    return %c0_i32, %c0_i32_0 : i32, i32
  }
  func.func @transform_2(%arg0: i32) -> (i32, i32) {
    %c0_i32 = arith.constant 0 : i32
    %c0_i32_0 = arith.constant 0 : i32
    %c0_i32_1 = arith.constant 0 : i32
    return %c0_i32, %c0_i32_0 : i32, i32
  }
  func.func @transform_3(%arg0: i32) -> (i32, i32) {
    %c0_i32 = arith.constant 0 : i32
    %c0_i32_0 = arith.constant 0 : i32
    %c0_i32_1 = arith.constant 0 : i32
    return %c0_i32, %c0_i32_0 : i32, i32
  }
  func.func @transform_4(%arg0: i32) -> (i32, i32) {
    %c0_i32 = arith.constant 0 : i32
    %c0_i32_0 = arith.constant 0 : i32
    %c0_i32_1 = arith.constant 0 : i32
    return %c0_i32, %c0_i32_0 : i32, i32
  }
  func.func @transform_5(%arg0: i32) -> (i32, i32) {
    %c0_i32 = arith.constant 0 : i32
    %c0_i32_0 = arith.constant 0 : i32
    %c0_i32_1 = arith.constant 0 : i32
    return %c0_i32, %c0_i32_0 : i32, i32
  }
  func.func @transform_6(%arg0: i32) -> (i32, i32) {
    %c0_i32 = arith.constant 0 : i32
    %c0_i32_0 = arith.constant 0 : i32
    return %arg0, %c0_i32 : i32, i32
  }
}

</mosaic_0001>

<bundles_post_ra>
// kernel: tpu_custom_call.1
= control target key start
LH: loop header
LB: loop body
LE: loop exit
PB: predicated region body
PF: predicated region fallthrough
CT: control target
= control target key end

     0   :  { %11 = vsyncpa [#allocation3], 0  ;;  %s809_s0 = inlined_call_operand.hbm [shape: bf16[16,32], index: 0, kind: input, shape index: {}]   ;;  %s810_s1 = inlined_call_operand.hbm [shape: bf16[32,256], index: 1, kind: input, shape index: {}]   ;;  %s811_s2 = inlined_call_operand.hbm [shape: f32[3,256], index: 2, kind: input, shape index: {}]   ;;  %s812_s3 = inlined_call_operand.hbm [shape: bf16[256,128], index: 3, kind: input, shape index: {}]   ;;  %s813_s4 = inlined_call_operand.vmem [shape: f32[3,128], index: 4, kind: input, shape index: {}]   ;;  %s814_s5 = inlined_call_operand.vmem [shape: f32[2,128], index: 5, kind: input, shape index: {}]   ;;  %s815_s6 = inlined_call_operand.vmem [shape: f32[16,1], index: 6, kind: output, shape index: {}]  }
   0x1   :  { %12 = vsyncpa [#allocation5], 0 }
   0x2   :  { %13 = vsyncpa [#allocation8], 0  ;;  %s652_s21 = smov [#allocation4]   ;;  %s558_s25 = scalar_lea.hbm %s810_s1, 512 }
   0x3   :  { %s31_s22 = sshll.u32 %s652_s21, 4  ;;  %p559_p0 = scmp.ne.s32.totalorder %s810_s1, %s558_s25  ;;  %s32_s22 = int_to_ptr.vmem [resolvable:$true] %s31_s22 }
   0x4   :  { %p562_p1 = scmp.lt.u32.totalorder %s558_s25, %s810_s1 }
   0x6   :  { %p564_p2 = pnand %p562_p1, %p559_p0 }
   0x8   :  { %567 = shalt.err (!%p564_p2)
}
   0x9   :  { %s568_s30 = scalar_lea.vmem %s32_s22, 512  ;;  %p573_p4 = scmp.lt.s32.totalorder %s32_s22, %s32_s22 }
   0xa   :  { %p569_p3 = scmp.ne.s32.totalorder %s32_s22, %s568_s30  ;;  %p574_p5 = scmp.lt.s32.totalorder %s568_s30, %s568_s30 }
   0xc   :  { %p575_p6 = por %p574_p5, %p573_p4 }
   0xe   :  { %p576_p7 = pnand %p575_p6, %p569_p3 }
  0x10   :  { %579 = shalt.err (!%p576_p7)
}
  0x11   :  { %s653_s7 = smov 128   ;;  %s654_s8 = smov 8  }
  0x12   :  { %37 = dma.hbm_to_vmem [thread:$0]  %s810_s1, 512, %s32_s22, [#allocation5], %s653_s7, %s653_s7, %s654_s8  }
  0x13   :  { %s655_s11 = smov [#allocation2]   ;;  %s580_s15 = scalar_lea.hbm %s809_s0, 128 }
  0x14   :  { %s19_s12 = sshll.u32 %s655_s11, 4  ;;  %p581_p8 = scmp.ne.s32.totalorder %s809_s0, %s580_s15  ;;  %s20_s12 = int_to_ptr.vmem [resolvable:$true] %s19_s12 }
  0x15   :  { %p584_p9 = scmp.lt.u32.totalorder %s580_s15, %s809_s0 }
  0x17   :  { %p586_p10 = pnand %p584_p9, %p581_p8 }
  0x19   :  { %589 = shalt.err (!%p586_p10)
}
  0x1a   :  { %s590_s20 = scalar_lea.vmem %s20_s12, 128  ;;  %p595_p12 = scmp.lt.s32.totalorder %s20_s12, %s20_s12 }
  0x1b   :  { %p591_p11 = scmp.ne.s32.totalorder %s20_s12, %s590_s20  ;;  %p596_p13 = scmp.lt.s32.totalorder %s590_s20, %s590_s20 }
  0x1d   :  { %p597_p0 = por %p596_p13, %p595_p12 }
  0x1f   :  { %p598_p1 = pnand %p597_p0, %p591_p11 }
  0x21   :  { %601 = shalt.err (!%p598_p1)
}
  0x22   :  { %s656_s1 = smov 64   ;;  %s657_s21 = smov 4  }
  0x23   :  { %25 = dma.hbm_to_vmem [thread:$0]  %s809_s0, 128, %s20_s12, [#allocation3], %s656_s1, %s656_s1, %s657_s21  }
  0x24   :  { %s658_s24 = smov [#allocation6]   ;;  %s659_s26 = smov [#allocation7]  }
  0x25   :  { %s44_s25 = sshll.u32 %s658_s24, 4  ;;  %s53_s27 = sshll.u32 %s659_s26, 4  ;;  %s45_s25 = int_to_ptr.vmem [resolvable:$true] %s44_s25  ;;  %s723_s27 = int_to_ptr.vmem [resolvable:$true] %s53_s27 }
  0x26   :  { %s602_s30 = scalar_lea.hbm %s811_s2, 128 }
  0x27   :  { %p603_p2 = scmp.ne.s32.totalorder %s811_s2, %s602_s30  ;;  %p606_p3 = scmp.lt.u32.totalorder %s602_s30, %s811_s2 }
  0x29   :  { %p608_p4 = pnand %p606_p3, %p603_p2 }
  0x2b   :  { %611 = shalt.err (!%p608_p4)
}
  0x2c   :  { %s612_s0 = scalar_lea.vmem %s45_s25, 128  ;;  %p617_p6 = scmp.lt.s32.totalorder %s45_s25, %s45_s25 }
  0x2d   :  { %p613_p5 = scmp.ne.s32.totalorder %s45_s25, %s612_s0  ;;  %p618_p7 = scmp.lt.s32.totalorder %s612_s0, %s612_s0 }
  0x2f   :  { %p619_p8 = por %p618_p7, %p617_p6 }
  0x31   :  { %p620_p9 = pnand %p619_p8, %p613_p5 }
  0x33   :  { %623 = shalt.err (!%p620_p9)
}
  0x34   :  { %47 = dma.hbm_to_vmem [thread:$0]  %s811_s2, 128, %s45_s25, [#allocation5]  }
  0x35   :  { %s624_s15 = scalar_lea.hbm %s812_s3, 2048 }
  0x36   :  { %p625_p10 = scmp.ne.s32.totalorder %s812_s3, %s624_s15  ;;  %p628_p11 = scmp.lt.u32.totalorder %s624_s15, %s812_s3 }
  0x38   :  { %p630_p12 = pnand %p628_p11, %p625_p10 }
  0x3a   :  { %633 = shalt.err (!%p630_p12)
}
  0x3b   :  { %s634_s20 = scalar_lea.vmem %s723_s27, 2048  ;;  %p639_p0 = scmp.lt.s32.totalorder %s723_s27, %s723_s27 }
  0x3c   :  { %p635_p13 = scmp.ne.s32.totalorder %s723_s27, %s634_s20  ;;  %p640_p1 = scmp.lt.s32.totalorder %s634_s20, %s634_s20 }
  0x3e   :  { %p641_p2 = por %p640_p1, %p639_p0 }
  0x40   :  { %p642_p3 = pnand %p641_p2, %p635_p13 }
  0x42   :  { %645 = shalt.err (!%p642_p3)
}
  0x43   :  { %59 = dma.hbm_to_vmem [thread:$0]  %s812_s3, 2048, %s723_s27, [#allocation8], %s656_s1, %s656_s1, %s657_s21  }
  0x44   :  { %646 = dma.done.wait [#allocation3], 128  }
  0x45   :  { %647 = vsyncadd [#allocation3], 4294967168 }
  0x46   :  { %648 = dma.done.wait [#allocation5], 640  }
  0x47   :  { %649 = vsyncadd [#allocation5], 4294966656 }
  0x48   :  { %650 = dma.done.wait [#allocation8], 2048  }
  0x49   :  { %651 = vsyncadd [#allocation8], 4294965248  ;;  %v660_v0 = vmov 0   ;;  %v527_v1 = vld [vmem:[#allocation4 + $0x4] ss:$8 sps:$4 sm:$0xff]   ;;  %vm130_vm0 = vcmask 261120   ;;  %v87_v8 = vlaneseq }
  0x4a   :  { %166 = vmatprep.mubr.bf16.mxu0 %v660_v0  ;;  %v529_v2 = vld [vmem:[#allocation4] ss:$8 sps:$4 sm:$0xff]   ;;  %134 = vmatprep.subr.bf16.mxu0 %v527_v1  ;;  %v530_v3 = vld [vmem:[#allocation4 + $0x14] ss:$8 sps:$4 sm:$0xff]   ;;  %v532_v4 = vld [vmem:[#allocation4 + $0x10] ss:$8 sps:$4 sm:$0xff]  }
  0x4b   :  { %135 = vmatpush1.bf16.msra.mxu0 %v529_v2  ;;  %v533_v5 = vld [vmem:[#allocation2] sm:$0xff]   ;;  %v534_v6 = vld [vmem:[#allocation7 + $0x40] sm:$0xff]   ;;  %v757_v9 = vshrl.u32 %v87_v8, 7  ;;  %v762_v11 = vld [vmem:[#allocation6] sm:$0x77]  ;;  %vm464_vm1 = vcmask 7168  }
  0x4c   :  { %136 = vmatprep.subr.bf16.mxu0 %v530_v3  ;;  %v535_v7 = vld [vmem:[#allocation7] sm:$0xff]   ;;  %496 = vmatprep.subr.bf16.mxu1 %v534_v6  ;;  %v536_v31 = vld [vmem:[#allocation7 + $0x48] sm:$0xff]   ;;  %v538_v33 = vld [vmem:[#allocation7 + $0x50] sm:$0xff]  }
  0x4d   :  { %497 = vmatpush3.bf16.msra.mxu1 %v535_v7  ;;  %v760_v10 = vsub.s32 0, %v757_v9  ;;  %v93_v12 = vsub.s32 4, %v757_v9  ;;  %v537_v32 = vld [vmem:[#allocation7 + $0x8] sm:$0xff]   ;;  %v539_v34 = vld [vmem:[#allocation7 + $0x10] sm:$0xff]   ;;  %v540_v35 = vld [vmem:[#allocation7 + $0x58] sm:$0xff]   ;;  %v779_v50 = vsub.s32 1, %v757_v9 }
  0x4e   :  { %498 = vmatprep.subr.bf16.mxu1 %v536_v31  ;;  %v541_v36 = vld [vmem:[#allocation7 + $0x18] sm:$0xff]   ;;  %v542_v37 = vld [vmem:[#allocation7 + $0x60] sm:$0xff]   ;;  %v544_v39 = vld [vmem:[#allocation7 + $0x68] sm:$0xff]   ;;  %v203_v51 = vsub.s32 5, %v757_v9  ;;  %v221_v54 = vsub.s32 2, %v757_v9  ;;  %v225_v55 = vsub.s32 6, %v757_v9 }
  0x4f   :  { %137 = vmatpush1.bf16.msra.mxu0 %v532_v4  ;;  %v90_v13 = vrot.slane %v762_v11, %v760_v10  ;;  %v94_v14 = vrot.slane %v762_v11, %v93_v12  ;;  %v543_v38 = vld [vmem:[#allocation7 + $0x20] sm:$0xff]   ;;  %v545_v40 = vld [vmem:[#allocation7 + $0x28] sm:$0xff]   ;;  %v546_v41 = vld [vmem:[#allocation7 + $0x70] sm:$0xff]   ;;  %v200_v56 = vrot.slane %v762_v11, %v779_v50 }
  0x50   :  { %v547_v42 = vld [vmem:[#allocation7 + $0x30] sm:$0xff]   ;;  %v548_v43 = vld [vmem:[#allocation7 + $0x78] sm:$0xff]   ;;  %v204_v53 = vrot.slane %v762_v11, %v203_v51  ;;  %v226_v58 = vrot.slane %v762_v11, %v225_v55  ;;  %v222_v60 = vrot.slane %v762_v11, %v221_v54 }
  0x51   :  { %v100_v15 = vrot.slane %v90_v13, %v760_v10  ;;  %v104_v16 = vrot.slane %v94_v14, %v760_v10  ;;  %499 = vmatpush3.bf16.msra.mxu1 %v537_v32  ;;  %v549_v44 = vld [vmem:[#allocation7 + $0x38] sm:$0xff]   ;;  %v210_v59 = vrot.slane %v200_v56, %v779_v50 }
  0x52   :  { %479 = vmatmul.mubr.msk.bf16.vlgmr.msra.gmra.mrb[0].mxu0 %vm130_vm0, %v533_v5  ;;  %500 = vmatprep.subr.bf16.mxu1 %v538_v33  ;;  %v214_v57 = vrot.slane %v204_v53, %v779_v50  ;;  %v236_v1 = vrot.slane %v226_v58, %v221_v54  ;;  %v232_v3 = vrot.slane %v222_v60, %v221_v54 }
  0x55   :  { %501 = vmatpush3.bf16.msra.mxu1 %v539_v34 }
  0x56   :  { %502 = vmatprep.subr.bf16.mxu1 %v540_v35 }
  0x59   :  { %503 = vmatpush3.bf16.msra.mxu1 %v541_v36 }
  0x5a   :  { %504 = vmatprep.subr.bf16.mxu1 %v542_v37 }
  0x5d   :  { %505 = vmatpush3.bf16.msra.mxu1 %v543_v38 }
  0x5e   :  { %506 = vmatprep.subr.bf16.mxu1 %v544_v39 }
  0x61   :  { %507 = vmatpush3.bf16.msra.mxu1 %v545_v40 }
  0x62   :  { %508 = vmatprep.subr.bf16.mxu1 %v546_v41 }
  0x65   :  { %509 = vmatpush3.bf16.msra.mxu1 %v547_v42  ;;  %v81_v42 = vld [vmem:[%s814_s5] sm:$0x3] }
  0x66   :  { %510 = vmatprep.subr.bf16.mxu1 %v548_v43 }
  0x69   :  { %511 = vmatpush3.bf16.msra.mxu1 %v549_v44 }
 0x125   :  { %v168_v17 = vpop.f32.mrb[0].mxu0 }
 0x126   :  { %v770_v18 = vadd.f32 %v168_v17, %v100_v15  ;;  %v170_v19 = vpop.f32.mrb[1].mxu0 }
 0x127   :  { %v171_v20 = vadd.f32 %v170_v19, %v104_v16  ;;  %v172_v21 = vpop.f32.mrb[2].mxu0 }
 0x128   :  { %v772_v22 = vadd.f32 %v172_v21, %v100_v15  ;;  %v174_v23 = vpop.f32.mrb[3].mxu0  ;;  %v177_v24 = vmul.f32 %v770_v18, %v770_v18 }
 0x129   :  { %v175_v25 = vadd.f32 %v174_v23, %v104_v16  ;;  %v178_v26 = vmul.f32 %v171_v20, %v171_v20 }
 0x12a   :  { %v179_v27 = vmul.f32 %v772_v22, %v772_v22 }
 0x12b   :  { %v180_v28 = vmul.f32 %v175_v25, %v175_v25  ;;  %v181_v29 = vadd.f32 %v178_v26, %v177_v24 }
 0x12d   :  { %182 = vadd.xlane.f32.xlu0 %v181_v29  ;;  %v184_v30 = vadd.f32 %v180_v28, %v179_v27 }
 0x131   :  { %185 = vadd.xlane.f32.xlu0 %v184_v30 }
 0x1ba   :  { %v183_v45 = vpop.xlane.xlu0 %182 }
 0x1bb   :  { %v187_v46 = vmul.f32 0.00390625, %v183_v45 }
 0x1bd   :  { %v189_v47 = vadd.f32 1e-05, %v187_v46  ;;  %v451_v46 = vrot.slane %v81_v42, %v760_v10 }
 0x1be   :  { %v186_v48 = vpop.xlane.xlu0 %185 }
 0x1bf   :  { %550 = vrsqrt.f32 %v189_v47  ;;  %v188_v49 = vmul.f32 0.00390625, %v186_v48 }
 0x1c1   :  { %v190_v52 = vadd.f32 1e-05, %v188_v49 }
 0x1c3   :  { %552 = vrsqrt.f32 %v190_v52 }
 0x1c9   :  { %v551_v61 = vpop.eup %550 }
 0x1ca   :  { %v194_v62 = vmul.f32 %v551_v61, %v171_v20  ;;  %v193_v63 = vmul.f32 %v551_v61, %v770_v18  ;;  %v80_v20 = vld [vmem:[%s813_s4] sm:$0x7] }
 0x1cb   :  { %v437_v38 = vrot.slane %v80_v20, %v779_v50  ;;  %v443_v41 = vrot.slane %v80_v20, %v221_v54  ;;  %v461_v54 = vrot.slane %v81_v42, %v779_v50 }
 0x1cc   :  { %v216_v0 = vmul.f32 %v214_v57, %v194_v62  ;;  %v215_v2 = vmul.f32 %v210_v59, %v193_v63 }
 0x1cd   :  { %v553_v4 = vpop.eup %552 }
 0x1ce   :  { %v196_v5 = vmul.f32 %v553_v4, %v175_v25  ;;  %v195_v6 = vmul.f32 %v553_v4, %v772_v22  ;;  %v238_v8 = vadd.f32 %v236_v1, %v216_v0  ;;  %v237_v12 = vadd.f32 %v232_v3, %v215_v2 }
 0x1cf   :  { %v282_v22 = vrot.slane %v80_v20, %v760_v10 }
 0x1d0   :  { %v218_v7 = vmul.f32 %v214_v57, %v196_v5  ;;  %v217_v9 = vmul.f32 %v210_v59, %v195_v6  ;;  %v242_v15 = vmax.f32 %v238_v8, 0.0  ;;  %v241_v16 = vmax.f32 %v237_v12, 0.0 }
 0x1d2   :  { %v240_v13 = vadd.f32 %v236_v1, %v218_v7  ;;  %v239_v14 = vadd.f32 %v232_v3, %v217_v9 }
 0x1d4   :  { %v244_v11 = vmax.f32 %v240_v13, 0.0  ;;  %v243_v17 = vmax.f32 %v239_v14, 0.0 }
 0x1d6   :  { %v246_v19 = vpack.c.bf16 %v244_v11, %v242_v15  ;;  %v245_v18 = vpack.c.bf16 %v243_v17, %v241_v16 }
 0x1d8   :  { %411 = vmatprep.mubr.bf16.mxu1 %v246_v19 }
 0x1d9   :  { %412 = vmatmul.mubr.bf16.vlgmr.msra.gmra.mrb[0].mxu1 %v245_v18 }
 0x2ac   :  { %v512_v21 = vpop.f32.mrb[0].mxu1 }
 0x2ad   :  { %v513_v23 = vpop.f32.mrb[1].mxu1 }
 0x2ae   :  { %v514_v24 = vadd.f32 %v513_v23, %v512_v21  ;;  %v515_v25 = vpop.f32.mrb[2].mxu1 }
 0x2af   :  { %v516_v26 = vpop.f32.mrb[3].mxu1 }
 0x2b0   :  { %v517_v27 = vadd.f32 %v516_v26, %v515_v25  ;;  %v414_v28 = vadd.f32 %v514_v24, %v282_v22 }
 0x2b2   :  { %v417_v29 = vadd.f32 %v517_v27, %v282_v22  ;;  %v420_v30 = vmul.f32 %v414_v28, %v414_v28 }
 0x2b4   :  { %422 = vadd.xlane.f32.xlu1 %v420_v30  ;;  %v421_v31 = vmul.f32 %v417_v29, %v417_v29 }
 0x2b8   :  { %424 = vadd.xlane.f32.xlu1 %v421_v31 }
 0x341   :  { %v423_v32 = vpop.xlane.xlu1 %422 }
 0x342   :  { %v426_v33 = vmul.f32 0.0078125, %v423_v32 }
 0x344   :  { %v428_v34 = vadd.f32 1e-05, %v426_v33 }
 0x345   :  { %v425_v35 = vpop.xlane.xlu1 %424 }
 0x346   :  { %554 = vrsqrt.f32 %v428_v34  ;;  %v427_v36 = vmul.f32 0.0078125, %v425_v35 }
 0x348   :  { %v429_v37 = vadd.f32 1e-05, %v427_v36 }
 0x34a   :  { %556 = vrsqrt.f32 %v429_v37 }
 0x350   :  { %v555_v39 = vpop.eup %554 }
 0x351   :  { %v432_v40 = vmul.f32 %v555_v39, %v414_v28 }
 0x353   :  { %v438_v43 = vmul.f32 %v437_v38, %v432_v40 }
 0x354   :  { %v557_v44 = vpop.eup %556 }
 0x355   :  { %v444_v45 = vadd.f32 %v443_v41, %v438_v43  ;;  %v433_v47 = vmul.f32 %v557_v44, %v417_v29 }
 0x357   :  { %v446_v48 = vmax.f32 %v444_v45, 0.0  ;;  %v439_v49 = vmul.f32 %v437_v38, %v433_v47 }
 0x359   :  { %v452_v51 = vmul.f32 %v451_v46, %v446_v48  ;;  %v445_v52 = vadd.f32 %v443_v41, %v439_v49 }
 0x35b   :  { %454 = vadd.xlane.f32.xlu0 %v452_v51  ;;  %v447_v53 = vmax.f32 %v445_v52, 0.0 }
 0x35d   :  { %v453_v55 = vmul.f32 %v451_v46, %v447_v53 }
 0x35f   :  { %456 = vadd.xlane.f32.xlu1 %v453_v55 }
 0x3e8   :  { %v455_v56 = vpop.xlane.xlu0 %454 }
 0x3e9   :  { %v462_v57 = vadd.f32 %v461_v54, %v455_v56 }
 0x3eb   :  { %465 = vst.msk [vmem:[%s815_s6] sm:$0xff] %vm464_vm1, %v462_v57 }
 0x3ec   :  { %v457_v58 = vpop.xlane.xlu1 %456 }
 0x3ed   :  { %v463_v10 = vadd.f32 %v461_v54, %v457_v58 }
 0x3ef   :  { %466 = vst.msk [vmem:[%s815_s6 + $0x8] sm:$0xff] %vm464_vm1, %v463_v10 }
 0x3f0   :  { %471 = vsyncpa [#allocation3], 1 }
 0x3f1   :  { %472 = vsyncpa [#allocation5], 1 }
 0x3f2   :  { %473 = vsyncpa [#allocation8], 1 }

// kernel: tpu_custom_call.1
= control target key start
LH: loop header
LB: loop body
LE: loop exit
PB: predicated region body
PF: predicated region fallthrough
CT: control target
= control target key end

     0   :  { %11 = vsyncpa [#allocation3], 0  ;;  %s809_s0 = inlined_call_operand.hbm [shape: bf16[16,32], index: 0, kind: input, shape index: {}]   ;;  %s810_s1 = inlined_call_operand.hbm [shape: bf16[32,256], index: 1, kind: input, shape index: {}]   ;;  %s811_s2 = inlined_call_operand.hbm [shape: f32[3,256], index: 2, kind: input, shape index: {}]   ;;  %s812_s3 = inlined_call_operand.hbm [shape: bf16[256,128], index: 3, kind: input, shape index: {}]   ;;  %s813_s4 = inlined_call_operand.vmem [shape: f32[3,128], index: 4, kind: input, shape index: {}]   ;;  %s814_s5 = inlined_call_operand.vmem [shape: f32[2,128], index: 5, kind: input, shape index: {}]   ;;  %s815_s6 = inlined_call_operand.vmem [shape: f32[16,1], index: 6, kind: output, shape index: {}]  }
   0x1   :  { %12 = vsyncpa [#allocation5], 0 }
   0x2   :  { %13 = vsyncpa [#allocation8], 0  ;;  %s652_s21 = smov [#allocation4]   ;;  %s558_s25 = scalar_lea.hbm %s810_s1, 512 }
   0x3   :  { %s31_s22 = sshll.u32 %s652_s21, 4  ;;  %p559_p0 = scmp.ne.s32.totalorder %s810_s1, %s558_s25  ;;  %s32_s22 = int_to_ptr.vmem [resolvable:$true] %s31_s22 }
   0x4   :  { %p562_p1 = scmp.lt.u32.totalorder %s558_s25, %s810_s1 }
   0x6   :  { %p564_p2 = pnand %p562_p1, %p559_p0 }
   0x8   :  { %567 = shalt.err (!%p564_p2)
}
   0x9   :  { %s568_s30 = scalar_lea.vmem %s32_s22, 512  ;;  %p573_p4 = scmp.lt.s32.totalorder %s32_s22, %s32_s22 }
   0xa   :  { %p569_p3 = scmp.ne.s32.totalorder %s32_s22, %s568_s30  ;;  %p574_p5 = scmp.lt.s32.totalorder %s568_s30, %s568_s30 }
   0xc   :  { %p575_p6 = por %p574_p5, %p573_p4 }
   0xe   :  { %p576_p7 = pnand %p575_p6, %p569_p3 }
  0x10   :  { %579 = shalt.err (!%p576_p7)
}
  0x11   :  { %s653_s7 = smov 128   ;;  %s654_s8 = smov 8  }
  0x12   :  { %37 = dma.hbm_to_vmem [thread:$0]  %s810_s1, 512, %s32_s22, [#allocation5], %s653_s7, %s653_s7, %s654_s8  }
  0x13   :  { %s655_s11 = smov [#allocation2]   ;;  %s580_s15 = scalar_lea.hbm %s809_s0, 128 }
  0x14   :  { %s19_s12 = sshll.u32 %s655_s11, 4  ;;  %p581_p8 = scmp.ne.s32.totalorder %s809_s0, %s580_s15  ;;  %s20_s12 = int_to_ptr.vmem [resolvable:$true] %s19_s12 }
  0x15   :  { %p584_p9 = scmp.lt.u32.totalorder %s580_s15, %s809_s0 }
  0x17   :  { %p586_p10 = pnand %p584_p9, %p581_p8 }
  0x19   :  { %589 = shalt.err (!%p586_p10)
}
  0x1a   :  { %s590_s20 = scalar_lea.vmem %s20_s12, 128  ;;  %p595_p12 = scmp.lt.s32.totalorder %s20_s12, %s20_s12 }
  0x1b   :  { %p591_p11 = scmp.ne.s32.totalorder %s20_s12, %s590_s20  ;;  %p596_p13 = scmp.lt.s32.totalorder %s590_s20, %s590_s20 }
  0x1d   :  { %p597_p0 = por %p596_p13, %p595_p12 }
  0x1f   :  { %p598_p1 = pnand %p597_p0, %p591_p11 }
  0x21   :  { %601 = shalt.err (!%p598_p1)
}
  0x22   :  { %s656_s1 = smov 64   ;;  %s657_s21 = smov 4  }
  0x23   :  { %25 = dma.hbm_to_vmem [thread:$0]  %s809_s0, 128, %s20_s12, [#allocation3], %s656_s1, %s656_s1, %s657_s21  }
  0x24   :  { %s658_s24 = smov [#allocation6]   ;;  %s659_s26 = smov [#allocation7]  }
  0x25   :  { %s44_s25 = sshll.u32 %s658_s24, 4  ;;  %s53_s27 = sshll.u32 %s659_s26, 4  ;;  %s45_s25 = int_to_ptr.vmem [resolvable:$true] %s44_s25  ;;  %s723_s27 = int_to_ptr.vmem [resolvable:$true] %s53_s27 }
  0x26   :  { %s602_s30 = scalar_lea.hbm %s811_s2, 128 }
  0x27   :  { %p603_p2 = scmp.ne.s32.totalorder %s811_s2, %s602_s30  ;;  %p606_p3 = scmp.lt.u32.totalorder %s602_s30, %s811_s2 }
  0x29   :  { %p608_p4 = pnand %p606_p3, %p603_p2 }
  0x2b   :  { %611 = shalt.err (!%p608_p4)
}
  0x2c   :  { %s612_s0 = scalar_lea.vmem %s45_s25, 128  ;;  %p617_p6 = scmp.lt.s32.totalorder %s45_s25, %s45_s25 }
  0x2d   :  { %p613_p5 = scmp.ne.s32.totalorder %s45_s25, %s612_s0  ;;  %p618_p7 = scmp.lt.s32.totalorder %s612_s0, %s612_s0 }
  0x2f   :  { %p619_p8 = por %p618_p7, %p617_p6 }
  0x31   :  { %p620_p9 = pnand %p619_p8, %p613_p5 }
  0x33   :  { %623 = shalt.err (!%p620_p9)
}
  0x34   :  { %47 = dma.hbm_to_vmem [thread:$0]  %s811_s2, 128, %s45_s25, [#allocation5]  }
  0x35   :  { %s624_s15 = scalar_lea.hbm %s812_s3, 2048 }
  0x36   :  { %p625_p10 = scmp.ne.s32.totalorder %s812_s3, %s624_s15  ;;  %p628_p11 = scmp.lt.u32.totalorder %s624_s15, %s812_s3 }
  0x38   :  { %p630_p12 = pnand %p628_p11, %p625_p10 }
  0x3a   :  { %633 = shalt.err (!%p630_p12)
}
  0x3b   :  { %s634_s20 = scalar_lea.vmem %s723_s27, 2048  ;;  %p639_p0 = scmp.lt.s32.totalorder %s723_s27, %s723_s27 }
  0x3c   :  { %p635_p13 = scmp.ne.s32.totalorder %s723_s27, %s634_s20  ;;  %p640_p1 = scmp.lt.s32.totalorder %s634_s20, %s634_s20 }
  0x3e   :  { %p641_p2 = por %p640_p1, %p639_p0 }
  0x40   :  { %p642_p3 = pnand %p641_p2, %p635_p13 }
  0x42   :  { %645 = shalt.err (!%p642_p3)
}
  0x43   :  { %59 = dma.hbm_to_vmem [thread:$0]  %s812_s3, 2048, %s723_s27, [#allocation8], %s656_s1, %s656_s1, %s657_s21  }
  0x44   :  { %646 = dma.done.wait [#allocation3], 128  }
  0x45   :  { %647 = vsyncadd [#allocation3], 4294967168 }
  0x46   :  { %648 = dma.done.wait [#allocation5], 640  }
  0x47   :  { %649 = vsyncadd [#allocation5], 4294966656 }
  0x48   :  { %650 = dma.done.wait [#allocation8], 2048  }
  0x49   :  { %651 = vsyncadd [#allocation8], 4294965248  ;;  %v660_v0 = vmov 0   ;;  %v527_v1 = vld [vmem:[#allocation4 + $0x4] ss:$8 sps:$4 sm:$0xff]   ;;  %vm130_vm0 = vcmask 261120   ;;  %v87_v8 = vlaneseq }
  0x4a   :  { %166 = vmatprep.mubr.bf16.mxu0 %v660_v0  ;;  %v529_v2 = vld [vmem:[#allocation4] ss:$8 sps:$4 sm:$0xff]   ;;  %134 = vmatprep.subr.bf16.mxu0 %v527_v1  ;;  %v530_v3 = vld [vmem:[#allocation4 + $0x14] ss:$8 sps:$4 sm:$0xff]   ;;  %v532_v4 = vld [vmem:[#allocation4 + $0x10] ss:$8 sps:$4 sm:$0xff]  }
  0x4b   :  { %135 = vmatpush1.bf16.msra.mxu0 %v529_v2  ;;  %v533_v5 = vld [vmem:[#allocation2] sm:$0xff]   ;;  %v534_v6 = vld [vmem:[#allocation7 + $0x40] sm:$0xff]   ;;  %v757_v9 = vshrl.u32 %v87_v8, 7  ;;  %v762_v11 = vld [vmem:[#allocation6] sm:$0x77]  ;;  %vm464_vm1 = vcmask 7168  }
  0x4c   :  { %136 = vmatprep.subr.bf16.mxu0 %v530_v3  ;;  %v535_v7 = vld [vmem:[#allocation7] sm:$0xff]   ;;  %496 = vmatprep.subr.bf16.mxu1 %v534_v6  ;;  %v536_v31 = vld [vmem:[#allocation7 + $0x48] sm:$0xff]   ;;  %v538_v33 = vld [vmem:[#allocation7 + $0x50] sm:$0xff]  }
  0x4d   :  { %497 = vmatpush3.bf16.msra.mxu1 %v535_v7  ;;  %v760_v10 = vsub.s32 0, %v757_v9  ;;  %v93_v12 = vsub.s32 4, %v757_v9  ;;  %v537_v32 = vld [vmem:[#allocation7 + $0x8] sm:$0xff]   ;;  %v539_v34 = vld [vmem:[#allocation7 + $0x10] sm:$0xff]   ;;  %v540_v35 = vld [vmem:[#allocation7 + $0x58] sm:$0xff]   ;;  %v779_v50 = vsub.s32 1, %v757_v9 }
  0x4e   :  { %498 = vmatprep.subr.bf16.mxu1 %v536_v31  ;;  %v541_v36 = vld [vmem:[#allocation7 + $0x18] sm:$0xff]   ;;  %v542_v37 = vld [vmem:[#allocation7 + $0x60] sm:$0xff]   ;;  %v544_v39 = vld [vmem:[#allocation7 + $0x68] sm:$0xff]   ;;  %v203_v51 = vsub.s32 5, %v757_v9  ;;  %v221_v54 = vsub.s32 2, %v757_v9  ;;  %v225_v55 = vsub.s32 6, %v757_v9 }
  0x4f   :  { %137 = vmatpush1.bf16.msra.mxu0 %v532_v4  ;;  %v90_v13 = vrot.slane %v762_v11, %v760_v10  ;;  %v94_v14 = vrot.slane %v762_v11, %v93_v12  ;;  %v543_v38 = vld [vmem:[#allocation7 + $0x20] sm:$0xff]   ;;  %v545_v40 = vld [vmem:[#allocation7 + $0x28] sm:$0xff]   ;;  %v546_v41 = vld [vmem:[#allocation7 + $0x70] sm:$0xff]   ;;  %v200_v56 = vrot.slane %v762_v11, %v779_v50 }
  0x50   :  { %v547_v42 = vld [vmem:[#allocation7 + $0x30] sm:$0xff]   ;;  %v548_v43 = vld [vmem:[#allocation7 + $0x78] sm:$0xff]   ;;  %v204_v53 = vrot.slane %v762_v11, %v203_v51  ;;  %v226_v58 = vrot.slane %v762_v11, %v225_v55  ;;  %v222_v60 = vrot.slane %v762_v11, %v221_v54 }
  0x51   :  { %v100_v15 = vrot.slane %v90_v13, %v760_v10  ;;  %v104_v16 = vrot.slane %v94_v14, %v760_v10  ;;  %499 = vmatpush3.bf16.msra.mxu1 %v537_v32  ;;  %v549_v44 = vld [vmem:[#allocation7 + $0x38] sm:$0xff]   ;;  %v210_v59 = vrot.slane %v200_v56, %v779_v50 }
  0x52   :  { %479 = vmatmul.mubr.msk.bf16.vlgmr.msra.gmra.mrb[0].mxu0 %vm130_vm0, %v533_v5  ;;  %500 = vmatprep.subr.bf16.mxu1 %v538_v33  ;;  %v214_v57 = vrot.slane %v204_v53, %v779_v50  ;;  %v236_v1 = vrot.slane %v226_v58, %v221_v54  ;;  %v232_v3 = vrot.slane %v222_v60, %v221_v54 }
  0x55   :  { %501 = vmatpush3.bf16.msra.mxu1 %v539_v34 }
  0x56   :  { %502 = vmatprep.subr.bf16.mxu1 %v540_v35 }
  0x59   :  { %503 = vmatpush3.bf16.msra.mxu1 %v541_v36 }
  0x5a   :  { %504 = vmatprep.subr.bf16.mxu1 %v542_v37 }
  0x5d   :  { %505 = vmatpush3.bf16.msra.mxu1 %v543_v38 }
  0x5e   :  { %506 = vmatprep.subr.bf16.mxu1 %v544_v39 }
  0x61   :  { %507 = vmatpush3.bf16.msra.mxu1 %v545_v40 }
  0x62   :  { %508 = vmatprep.subr.bf16.mxu1 %v546_v41 }
  0x65   :  { %509 = vmatpush3.bf16.msra.mxu1 %v547_v42  ;;  %v81_v42 = vld [vmem:[%s814_s5] sm:$0x3] }
  0x66   :  { %510 = vmatprep.subr.bf16.mxu1 %v548_v43 }
  0x69   :  { %511 = vmatpush3.bf16.msra.mxu1 %v549_v44 }
 0x125   :  { %v168_v17 = vpop.f32.mrb[0].mxu0 }
 0x126   :  { %v770_v18 = vadd.f32 %v168_v17, %v100_v15  ;;  %v170_v19 = vpop.f32.mrb[1].mxu0 }
 0x127   :  { %v171_v20 = vadd.f32 %v170_v19, %v104_v16  ;;  %v172_v21 = vpop.f32.mrb[2].mxu0 }
 0x128   :  { %v772_v22 = vadd.f32 %v172_v21, %v100_v15  ;;  %v174_v23 = vpop.f32.mrb[3].mxu0  ;;  %v177_v24 = vmul.f32 %v770_v18, %v770_v18 }
 0x129   :  { %v175_v25 = vadd.f32 %v174_v23, %v104_v16  ;;  %v178_v26 = vmul.f32 %v171_v20, %v171_v20 }
 0x12a   :  { %v179_v27 = vmul.f32 %v772_v22, %v772_v22 }
 0x12b   :  { %v180_v28 = vmul.f32 %v175_v25, %v175_v25  ;;  %v181_v29 = vadd.f32 %v178_v26, %v177_v24 }
 0x12d   :  { %182 = vadd.xlane.f32.xlu0 %v181_v29  ;;  %v184_v30 = vadd.f32 %v180_v28, %v179_v27 }
 0x131   :  { %185 = vadd.xlane.f32.xlu0 %v184_v30 }
 0x1ba   :  { %v183_v45 = vpop.xlane.xlu0 %182 }
 0x1bb   :  { %v187_v46 = vmul.f32 0.00390625, %v183_v45 }
 0x1bd   :  { %v189_v47 = vadd.f32 1e-05, %v187_v46  ;;  %v451_v46 = vrot.slane %v81_v42, %v760_v10 }
 0x1be   :  { %v186_v48 = vpop.xlane.xlu0 %185 }
 0x1bf   :  { %550 = vrsqrt.f32 %v189_v47  ;;  %v188_v49 = vmul.f32 0.00390625, %v186_v48 }
 0x1c1   :  { %v190_v52 = vadd.f32 1e-05, %v188_v49 }
 0x1c3   :  { %552 = vrsqrt.f32 %v190_v52 }
 0x1c9   :  { %v551_v61 = vpop.eup %550 }
 0x1ca   :  { %v194_v62 = vmul.f32 %v551_v61, %v171_v20  ;;  %v193_v63 = vmul.f32 %v551_v61, %v770_v18  ;;  %v80_v20 = vld [vmem:[%s813_s4] sm:$0x7] }
 0x1cb   :  { %v437_v38 = vrot.slane %v80_v20, %v779_v50  ;;  %v443_v41 = vrot.slane %v80_v20, %v221_v54  ;;  %v461_v54 = vrot.slane %v81_v42, %v779_v50 }
 0x1cc   :  { %v216_v0 = vmul.f32 %v214_v57, %v194_v62  ;;  %v215_v2 = vmul.f32 %v210_v59, %v193_v63 }
 0x1cd   :  { %v553_v4 = vpop.eup %552 }
 0x1ce   :  { %v196_v5 = vmul.f32 %v553_v4, %v175_v25  ;;  %v195_v6 = vmul.f32 %v553_v4, %v772_v22  ;;  %v238_v8 = vadd.f32 %v236_v1, %v216_v0  ;;  %v237_v12 = vadd.f32 %v232_v3, %v215_v2 }
 0x1cf   :  { %v282_v22 = vrot.slane %v80_v20, %v760_v10 }
 0x1d0   :  { %v218_v7 = vmul.f32 %v214_v57, %v196_v5  ;;  %v217_v9 = vmul.f32 %v210_v59, %v195_v6  ;;  %v242_v15 = vmax.f32 %v238_v8, 0.0  ;;  %v241_v16 = vmax.f32 %v237_v12, 0.0 }
 0x1d2   :  { %v240_v13 = vadd.f32 %v236_v1, %v218_v7  ;;  %v239_v14 = vadd.f32 %v232_v3, %v217_v9 }
 0x1d4   :  { %v244_v11 = vmax.f32 %v240_v13, 0.0  ;;  %v243_v17 = vmax.f32 %v239_v14, 0.0 }
 0x1d6   :  { %v246_v19 = vpack.c.bf16 %v244_v11, %v242_v15  ;;  %v245_v18 = vpack.c.bf16 %v243_v17, %v241_v16 }
 0x1d8   :  { %411 = vmatprep.mubr.bf16.mxu1 %v246_v19 }
 0x1d9   :  { %412 = vmatmul.mubr.bf16.vlgmr.msra.gmra.mrb[0].mxu1 %v245_v18 }
 0x2ac   :  { %v512_v21 = vpop.f32.mrb[0].mxu1 }
 0x2ad   :  { %v513_v23 = vpop.f32.mrb[1].mxu1 }
 0x2ae   :  { %v514_v24 = vadd.f32 %v513_v23, %v512_v21  ;;  %v515_v25 = vpop.f32.mrb[2].mxu1 }
 0x2af   :  { %v516_v26 = vpop.f32.mrb[3].mxu1 }
 0x2b0   :  { %v517_v27 = vadd.f32 %v516_v26, %v515_v25  ;;  %v414_v28 = vadd.f32 %v514_v24, %v282_v22 }
 0x2b2   :  { %v417_v29 = vadd.f32 %v517_v27, %v282_v22  ;;  %v420_v30 = vmul.f32 %v414_v28, %v414_v28 }
 0x2b4   :  { %422 = vadd.xlane.f32.xlu1 %v420_v30  ;;  %v421_v31 = vmul.f32 %v417_v29, %v417_v29 }
 0x2b8   :  { %424 = vadd.xlane.f32.xlu1 %v421_v31 }
 0x341   :  { %v423_v32 = vpop.xlane.xlu1 %422 }
 0x342   :  { %v426_v33 = vmul.f32 0.0078125, %v423_v32 }
 0x344   :  { %v428_v34 = vadd.f32 1e-05, %v426_v33 }
 0x345   :  { %v425_v35 = vpop.xlane.xlu1 %424 }
 0x346   :  { %554 = vrsqrt.f32 %v428_v34  ;;  %v427_v36 = vmul.f32 0.0078125, %v425_v35 }
 0x348   :  { %v429_v37 = vadd.f32 1e-05, %v427_v36 }
 0x34a   :  { %556 = vrsqrt.f32 %v429_v37 }
 0x350   :  { %v555_v39 = vpop.eup %554 }
 0x351   :  { %v432_v40 = vmul.f32 %v555_v39, %v414_v28 }
 0x353   :  { %v438_v43 = vmul.f32 %v437_v38, %v432_v40 }
 0x354   :  { %v557_v44 = vpop.eup %556 }
 0x355   :  { %v444_v45 = vadd.f32 %v443_v41, %v438_v43  ;;  %v433_v47 = vmul.f32 %v557_v44, %v417_v29 }
 0x357   :  { %v446_v48 = vmax.f32 %v444_v45, 0.0  ;;  %v439_v49 = vmul.f32 %v437_v38, %v433_v47 }
 0x359   :  { %v452_v51 = vmul.f32 %v451_v46, %v446_v48  ;;  %v445_v52 = vadd.f32 %v443_v41, %v439_v49 }
 0x35b   :  { %454 = vadd.xlane.f32.xlu0 %v452_v51  ;;  %v447_v53 = vmax.f32 %v445_v52, 0.0 }
 0x35d   :  { %v453_v55 = vmul.f32 %v451_v46, %v447_v53 }
 0x35f   :  { %456 = vadd.xlane.f32.xlu1 %v453_v55 }
 0x3e8   :  { %v455_v56 = vpop.xlane.xlu0 %454 }
 0x3e9   :  { %v462_v57 = vadd.f32 %v461_v54, %v455_v56 }
 0x3eb   :  { %465 = vst.msk [vmem:[%s815_s6] sm:$0xff] %vm464_vm1, %v462_v57 }
 0x3ec   :  { %v457_v58 = vpop.xlane.xlu1 %456 }
 0x3ed   :  { %v463_v10 = vadd.f32 %v461_v54, %v457_v58 }
 0x3ef   :  { %466 = vst.msk [vmem:[%s815_s6 + $0x8] sm:$0xff] %vm464_vm1, %v463_v10 }
 0x3f0   :  { %471 = vsyncpa [#allocation3], 1 }
 0x3f1   :  { %472 = vsyncpa [#allocation5], 1 }
 0x3f2   :  { %473 = vsyncpa [#allocation8], 1 }

</bundles_post_ra>
